<compile_context>
chip_gen: v5e
topology: v5e:2x2
jax: 0.10.0
libtpu: 0.0.40
codegen_flags: <defaults>
</compile_context>

<pallas_src>
import functools

import jax
import jax.numpy as jnp
from jax.experimental import pallas as pl
from jax.experimental.pallas import tpu as pltpu

LANE = 128


def _round_up(x, m):
    return (x + m - 1) // m * m


# -----------------------------------------------------------------------------
# Kernel: one grid step == tb batch elements; all layers fused.
# -----------------------------------------------------------------------------
def fc_triplane_kernel(x_ref,            # (tb*L, in_ch)  f32
                       w1_ref, c1_ref,   # fused conv1+BN: (in_ch, H1p) bf16, (1, H1p) f32
                       w2_ref, c2_ref,   # fused conv2+BN: (H1p, H2p)  bf16, (1, H2p) f32
                       wc_ref, bc_ref,   # classifier:     (H2p, NCp)  bf16, (1, NCp) f32
                       out_ref):         # (tb, NCp) f32
    tb = out_ref.shape[0]
    rows = x_ref.shape[0]
    L = rows // tb

    # bf16 cast on the VPU (x is DMA'd as f32 straight from HBM).
    h = x_ref[...].astype(w1_ref.dtype)                                  # (rows, in_ch)

    # --- layer 1: Conv1d(k=1)+BN folded into matmul+bias, then ReLU (f32 VPU)
    z = jnp.dot(h, w1_ref[...], preferred_element_type=jnp.float32) + c1_ref[...]
    h1 = jnp.maximum(z, 0.0)                                             # (rows, H1p) f32

    # --- layer 2
    z = jnp.dot(h1.astype(w2_ref.dtype), w2_ref[...],
                preferred_element_type=jnp.float32) + c2_ref[...]
    h2 = jnp.maximum(z, 0.0)                                             # (rows, H2p) f32

    # --- torch.max(x, 2): max over sequence positions (tile-aligned reshape:
    #     H2p is a multiple of 128, rows splits on a sublane boundary).
    m = jnp.max(h2.reshape(tb, L, h2.shape[-1]), axis=1)                 # (tb, H2p)

    # --- classifier Linear(H2p -> NCp), lane-dense output
    out = jnp.dot(m.astype(wc_ref.dtype), wc_ref[...],
                  preferred_element_type=jnp.float32) + bc_ref[...]
    out_ref[...] = out.astype(out_ref.dtype)


# -----------------------------------------------------------------------------
# Wrapper helpers
# -----------------------------------------------------------------------------
def _rep_spec(shape):
    """Full-array block, replicated (grid-constant) across the batch grid."""
    nd = len(shape)
    # NOTE: for realistic layer widths use pipeline_mode=pl.Buffered(1) here to
    # drop the (unused) second buffer of these grid-constant blocks.
    return pl.BlockSpec(shape, lambda b, _nd=nd: (0,) * _nd)


def _tensorcores_per_device():
    """Best-effort TC count of device 0 (v7x/megacore => prefer an even grid)."""
    try:
        dev = jax.devices()[0]
    except Exception:
        return 1
    for attr in ("num_cores", "core_count"):
        v = getattr(dev, attr, None)
        if isinstance(v, int) and v >= 1:
            return v
    return 1


def _auto_tb(B, L, n_cores):
    """Batch tile: one tile per TensorCore when the batch splits evenly,
    otherwise the whole padded batch; capped so tb*L stays ~<= 2048 rows."""
    Bp = _round_up(B, 8)
    tb = Bp
    if n_cores > 1 and Bp % (8 * n_cores) == 0 and Bp // n_cores >= 8:
        tb = Bp // n_cores
    max_rows = 2048
    tb_cap = max(8, _round_up(max(1, max_rows // max(L, 1)), 8))
    return max(8, min(tb, tb_cap))


def _vmem_bytes_estimate(rows, tb, in_ch, h1p, h2p, ncp):
    x_tile = rows * in_ch * 4 * 2                                   # f32 in, dbl-buffered
    out_tile = tb * ncp * 4 * 2                                     # f32 out, dbl-buffered
    weights = 2 * ((in_ch * h1p + h1p * h2p + h2p * ncp) * 2        # bf16 weights
                   + (h1p + h2p + ncp) * 4)                         # f32 biases
    inter = rows * (h1p + h2p) * 4 + rows * max(in_ch, h1p, h2p) * 2 \
        + tb * (h2p + ncp) * 4
    return x_tile + out_tile + weights + inter


def fuse_params(params, compute_dtype=jnp.bfloat16):
    """Fold eval-mode BN into conv weights/bias and lane-pad all output dims.

    Padding is pure zeros: padded h1/h2 columns stay 0 through bias+ReLU and the
    padded W2/wc input rows are 0, so results are unchanged after the final
    [:, :num_classes] slice.
    """
    (w1, b1, s1, t1, w2, b2, s2, t2, wc, bc) = params
    in_ch, H1 = w1.shape
    H2 = w2.shape[1]
    nc = wc.shape[1]
    h1p = _round_up(H1, LANE)
    h2p = _round_up(H2, LANE)
    ncp = _round_up(nc, LANE)

    # (x@W + b)*s + t  ==  x@(W*s) + (b*s + t)
    w1f = jnp.zeros((in_ch, h1p), jnp.float32).at[:, :H1].set(w1 * s1)
    c1 = jnp.zeros((1, h1p), jnp.float32).at[:, :H1].set(b1 * s1 + t1)
    w2f = jnp.zeros((h1p, h2p), jnp.float32).at[:H1, :H2].set(w2 * s2)
    c2 = jnp.zeros((1, h2p), jnp.float32).at[:, :H2].set(b2 * s2 + t2)
    wcp = jnp.zeros((h2p, ncp), jnp.float32).at[:H2, :nc].set(wc)
    bcp = jnp.zeros((1, ncp), jnp.float32).at[:, :nc].set(bc)

    return (w1f.astype(compute_dtype), c1,
            w2f.astype(compute_dtype), c2,
            wcp.astype(compute_dtype), bcp)


# -----------------------------------------------------------------------------
# Forward
# -----------------------------------------------------------------------------
@functools.partial(jax.jit, static_argnames=("num_classes", "tb"))
def fc_triplane_forward(x, fused_params, num_classes, tb=None):
    """x: (B, C, E, E) float32, like the PyTorch module input."""
    B, C, E1, E2 = x.shape
    in_ch = E1 * E2
    L = C                                   # Conv1d sequence length after permute

    (w1f, c1, w2f, c2, wcp, bcp) = fused_params
    h1p = w1f.shape[1]
    h2p = w2f.shape[1]
    ncp = wcp.shape[1]

    if tb is None:
        tb = _auto_tb(B, L, _tensorcores_per_device())
    assert tb >= 8 and tb % 8 == 0, "batch tile must be a multiple of 8"

    nb = pl.cdiv(B, tb)
    Bp = nb * tb
    rows = tb * L

    # torch: reshape(B, C, -1).permute(0,2,1) -> (B, in_ch, L); our layout is the
    # transpose (B, L, in_ch) == reshape(B, C, E*E).  Flatten to 2D in the
    # wrapper so the kernel's x block is a plain lane-major (rows, in_ch) DMA.
    xk = x.reshape(B, L, in_ch)
    if Bp != B:
        xk = jnp.pad(xk, ((0, Bp - B), (0, 0), (0, 0)))
    xk = xk.reshape(Bp * L, in_ch)          # stays float32; bf16 cast is in-kernel

    flops = 2 * Bp * L * (in_ch * h1p + h1p * h2p) + 2 * Bp * h2p * ncp
    bytes_accessed = (
        xk.size * xk.dtype.itemsize
        + sum(int(a.size) * a.dtype.itemsize for a in fused_params)
        + Bp * ncp * 4)

    vmem_limit = int(min(max(2 * _vmem_bytes_estimate(rows, tb, in_ch, h1p, h2p, ncp),
                             32 << 20), 64 << 20))

    out = pl.pallas_call(
        fc_triplane_kernel,
        out_shape=jax.ShapeDtypeStruct((Bp, ncp), jnp.float32),
        grid_spec=pltpu.PrefetchScalarGridSpec(
            num_scalar_prefetch=0,
            grid=(nb,),
            in_specs=[
                pl.BlockSpec((rows, in_ch), lambda b: (b, 0)),   # x tile (f32)
                _rep_spec((in_ch, h1p)),                          # fused W1
                _rep_spec((1, h1p)),                              # fused bias 1
                _rep_spec((h1p, h2p)),                            # fused W2
                _rep_spec((1, h2p)),                              # fused bias 2
                _rep_spec((h2p, ncp)),                            # classifier W
                _rep_spec((1, ncp)),                              # classifier bias
            ],
            out_specs=pl.BlockSpec((tb, ncp), lambda b: (b, 0)),
        ),
        compiler_params=pltpu.CompilerParams(
            dimension_semantics=("parallel",),
            vmem_limit_bytes=vmem_limit),
        cost_estimate=pl.CostEstimate(
            flops=flops, transcendentals=0, bytes_accessed=bytes_accessed),
    )(xk, w1f, c1, w2f, c2, wcp, bcp)

    return out[:B, :num_classes]


# -----------------------------------------------------------------------------
# Deterministic parameter construction (synthetic, mirrors __init__ shapes)
# -----------------------------------------------------------------------------
def init_params(key, in_ch, layers_dim, num_classes):
    assert len(layers_dim) == 2, "this script instantiates layers_dim of length 2"
    H1, H2 = layers_dim
    ks = jax.random.split(key, 12)
    eps = 1e-5

    def bn_fold(kg, kb, km, kv, dim):
        gamma = 1.0 + 0.1 * jax.random.normal(kg, (dim,), jnp.float32)
        beta = 0.1 * jax.random.normal(kb, (dim,), jnp.float32)
        r_mean = 0.1 * jax.random.normal(km, (dim,), jnp.float32)
        r_var = jax.random.uniform(kv, (dim,), jnp.float32, 0.5, 1.5)
        scale = gamma / jnp.sqrt(r_var + eps)
        shift = beta - r_mean * scale
        return scale.reshape(1, dim), shift.reshape(1, dim)

    # Conv weights stored as (in, out) == torch (out, in, 1)[:, :, 0].T
    w1 = 0.1 * jax.random.normal(ks[0], (in_ch, H1), jnp.float32)
    b1 = 0.1 * jax.random.normal(ks[1], (1, H1), jnp.float32)
    s1, t1 = bn_fold(ks[2], ks[3], ks[4], ks[5], H1)

    w2 = 0.1 * jax.random.normal(ks[6], (H1, H2), jnp.float32)
    b2 = 0.1 * jax.random.normal(ks[7], (1, H2), jnp.float32)
    s2, t2 = bn_fold(ks[8], ks[9], ks[10], ks[11], H2)

    kcw, kcb = jax.random.split(jax.random.fold_in(key, 99))
    wc = 0.1 * jax.random.normal(kcw, (H2, num_classes), jnp.float32)
    bc = 0.1 * jax.random.normal(kcb, (1, num_classes), jnp.float32)

    return (w1, b1, s1, t1, w2, b2, s2, t2, wc, bc)


# -----------------------------------------------------------------------------
# Pure-JAX references for validation
# -----------------------------------------------------------------------------
def ref_forward_f32(x, params):
    """Full-f32 reference with eval-mode BN (module semantics)."""
    (w1, b1, s1, t1, w2, b2, s2, t2, wc, bc) = params
    B, C, E1, E2 = x.shape
    h = x.reshape(B, C, E1 * E2).astype(jnp.float32)          # (B, L, in_ch)
    z = jnp.einsum("bli,io->blo", h, w1) + b1
    h = jnp.maximum(z * s1 + t1, 0.0)
    z = jnp.einsum("bli,io->blo", h, w2) + b2
    h = jnp.maximum(z * s2 + t2, 0.0)
    m = jnp.max(h, axis=1)                                    # (B, H2)
    return m @ wc + bc


def ref_forward_fused(x, fused_params, num_classes):
    """Same math as the kernel: padded bf16 matmul inputs, f32 accumulation."""
    (w1f, c1, w2f, c2, wcp, bcp) = fused_params
    B, C, E1, E2 = x.shape
    h = x.reshape(B, C, E1 * E2).astype(w1f.dtype)
    z = jnp.einsum("bli,io->blo", h, w1f,
                   preferred_element_type=jnp.float32) + c1
    h = jnp.maximum(z, 0.0)
    z = jnp.einsum("bli,io->blo", h.astype(w2f.dtype), w2f,
                   preferred_element_type=jnp.float32) + c2
    h = jnp.maximum(z, 0.0)
    m = jnp.max(h, axis=1)
    out = jnp.dot(m.astype(wcp.dtype), wcp,
                  preferred_element_type=jnp.float32) + bcp
    return out[:, :num_classes]


if __name__ == "__main__":
    # Small shapes consistent with the module: embedding_dim=8, channels=16,
    # layers_dim=[32, 64], num_classes=10, batch=16.
    B, channels, embedding_dim = 16, 16, 8
    layers_dim = [32, 64]
    num_classes = 10
    in_ch = embedding_dim * embedding_dim

    key = jax.random.PRNGKey(0)
    kx, kp = jax.random.split(key)
    x = jax.random.normal(kx, (B, channels, embedding_dim, embedding_dim), jnp.float32)
    params = init_params(kp, in_ch, layers_dim, num_classes)
    fused = fuse_params(params)

    out = fc_triplane_forward(x, fused, num_classes=num_classes)
    out = jax.block_until_ready(out)
    assert out.shape == (B, num_classes)

    # Tight check against a reference that uses the same bf16-input matmuls.
    ref_m = ref_forward_fused(x, fused, num_classes)
    assert jnp.allclose(out, ref_m, atol=1e-2, rtol=1e-2), (
        float(jnp.max(jnp.abs(out - ref_m))))

    # Loose sanity check against the full-f32 module semantics (bf16 MXU inputs).
    ref_f = ref_forward_f32(x, params)
    err = float(jnp.max(jnp.abs(out - ref_f)))
    assert err < 1e-1, err

    print("KERNEL_OK")
</pallas_src>

<mosaic_0001>
module attributes {stable_mosaic.version = 11 : i64} {
  func.func @fc_triplane_kernel(%arg0: i32, %arg1: memref<256x64xf32, #tpu.memory_space<vmem>>, %arg2: memref<64x128xbf16, #tpu.memory_space<vmem>>, %arg3: memref<1x128xf32, #tpu.memory_space<vmem>>, %arg4: memref<128x128xbf16, #tpu.memory_space<vmem>>, %arg5: memref<1x128xf32, #tpu.memory_space<vmem>>, %arg6: memref<128x128xbf16, #tpu.memory_space<vmem>>, %arg7: memref<1x128xf32, #tpu.memory_space<vmem>>, %arg8: memref<16x128xf32, #tpu.memory_space<vmem>>) attributes {dimension_semantics = [#tpu.dimension_semantics<parallel>], iteration_bounds = array<i64: 1>, scalar_prefetch = 0 : i64, scratch_operands = 0 : i64, tpu.core_type = #tpu.core_type<tc>, window_params = [{transform_indices = @transform_0, window_bounds = array<i64: 256, 64>}, {pipeline_mode = #tpu.pipeline_mode<synchronous>, transform_indices = @transform_1, window_bounds = array<i64: 64, 128>}, {pipeline_mode = #tpu.pipeline_mode<synchronous>, transform_indices = @transform_2, window_bounds = array<i64: 1, 128>}, {pipeline_mode = #tpu.pipeline_mode<synchronous>, transform_indices = @transform_3, window_bounds = array<i64: 128, 128>}, {pipeline_mode = #tpu.pipeline_mode<synchronous>, transform_indices = @transform_4, window_bounds = array<i64: 1, 128>}, {pipeline_mode = #tpu.pipeline_mode<synchronous>, transform_indices = @transform_5, window_bounds = array<i64: 128, 128>}, {pipeline_mode = #tpu.pipeline_mode<synchronous>, transform_indices = @transform_6, window_bounds = array<i64: 1, 128>}, {transform_indices = @transform_7, window_bounds = array<i64: 16, 128>}]} {
    %c0 = arith.constant 0 : index
    %c0_0 = arith.constant 0 : index
    %0 = vector.load %arg1[%c0, %c0_0] : memref<256x64xf32, #tpu.memory_space<vmem>>, vector<256x64xf32>
    %1 = arith.truncf %0 : vector<256x64xf32> to vector<256x64xbf16>
    %c0_1 = arith.constant 0 : index
    %c0_2 = arith.constant 0 : index
    %2 = vector.load %arg2[%c0_1, %c0_2] : memref<64x128xbf16, #tpu.memory_space<vmem>>, vector<64x128xbf16>
    %cst = arith.constant dense<0.000000e+00> : vector<256x128xf32>
    %3 = tpu.matmul %1, %2, %cst {dimension_numbers = #tpu.dot_dimension_numbers<[1], [0], [0], [1], [0, 0, 1, 1], [], []>} : vector<256x64xbf16>, vector<64x128xbf16>, vector<256x128xf32> -> vector<256x128xf32>
    %c0_3 = arith.constant 0 : index
    %c0_4 = arith.constant 0 : index
    %4 = vector.load %arg3[%c0_3, %c0_4] : memref<1x128xf32, #tpu.memory_space<vmem>>, vector<1x128xf32>
    %5 = vector.broadcast %4 : vector<1x128xf32> to vector<256x128xf32>
    %6 = arith.addf %3, %5 : vector<256x128xf32>
    %cst_5 = arith.constant 0.000000e+00 : f32
    %7 = vector.broadcast %cst_5 : f32 to vector<256x128xf32>
    %8 = arith.maximumf %6, %7 : vector<256x128xf32>
    %9 = arith.truncf %8 : vector<256x128xf32> to vector<256x128xbf16>
    %c0_6 = arith.constant 0 : index
    %c0_7 = arith.constant 0 : index
    %10 = vector.load %arg4[%c0_6, %c0_7] : memref<128x128xbf16, #tpu.memory_space<vmem>>, vector<128x128xbf16>
    %cst_8 = arith.constant dense<0.000000e+00> : vector<256x128xf32>
    %11 = tpu.matmul %9, %10, %cst_8 {dimension_numbers = #tpu.dot_dimension_numbers<[1], [0], [0], [1], [0, 0, 1, 1], [], []>} : vector<256x128xbf16>, vector<128x128xbf16>, vector<256x128xf32> -> vector<256x128xf32>
    %c0_9 = arith.constant 0 : index
    %c0_10 = arith.constant 0 : index
    %12 = vector.load %arg5[%c0_9, %c0_10] : memref<1x128xf32, #tpu.memory_space<vmem>>, vector<1x128xf32>
    %13 = vector.broadcast %12 : vector<1x128xf32> to vector<256x128xf32>
    %14 = arith.addf %11, %13 : vector<256x128xf32>
    %cst_11 = arith.constant 0.000000e+00 : f32
    %15 = vector.broadcast %cst_11 : f32 to vector<256x128xf32>
    %16 = arith.maximumf %14, %15 : vector<256x128xf32>
    %17 = vector.shape_cast %16 : vector<256x128xf32> to vector<16x16x128xf32>
    %cst_12 = arith.constant dense<0xFF800000> : vector<16x128xf32>
    %18 = vector.multi_reduction <maximumf>, %17, %cst_12 [1] : vector<16x16x128xf32> to vector<16x128xf32>
    %19 = arith.truncf %18 : vector<16x128xf32> to vector<16x128xbf16>
    %c0_13 = arith.constant 0 : index
    %c0_14 = arith.constant 0 : index
    %20 = vector.load %arg6[%c0_13, %c0_14] : memref<128x128xbf16, #tpu.memory_space<vmem>>, vector<128x128xbf16>
    %cst_15 = arith.constant dense<0.000000e+00> : vector<16x128xf32>
    %21 = tpu.matmul %19, %20, %cst_15 {dimension_numbers = #tpu.dot_dimension_numbers<[1], [0], [0], [1], [0, 0, 1, 1], [], []>} : vector<16x128xbf16>, vector<128x128xbf16>, vector<16x128xf32> -> vector<16x128xf32>
    %c0_16 = arith.constant 0 : index
    %c0_17 = arith.constant 0 : index
    %22 = vector.load %arg7[%c0_16, %c0_17] : memref<1x128xf32, #tpu.memory_space<vmem>>, vector<1x128xf32>
    %23 = vector.broadcast %22 : vector<1x128xf32> to vector<16x128xf32>
    %24 = arith.addf %21, %23 : vector<16x128xf32>
    %c0_18 = arith.constant 0 : index
    %c0_19 = arith.constant 0 : index
    %25 = vector.load %arg8[%c0_18, %c0_19] : memref<16x128xf32, #tpu.memory_space<vmem>>, vector<16x128xf32>
    tpu.vector_store %arg8[%c0_18, %c0_19], %24 {strides = array<i32>} : memref<16x128xf32, #tpu.memory_space<vmem>>, vector<16x128xf32>,
    return
  }
  func.func @transform_0(%arg0: i32) -> (i32, i32) {
    %c0_i32 = arith.constant 0 : i32
    %c0_i32_0 = arith.constant 0 : i32
    return %arg0, %c0_i32 : i32, i32
  }
  func.func @transform_1(%arg0: i32) -> (i32, i32) {
    %c0_i32 = arith.constant 0 : i32
    %c0_i32_0 = arith.constant 0 : i32
    %c0_i32_1 = arith.constant 0 : i32
    return %c0_i32, %c0_i32_0 : i32, i32
  }
  func.func @transform_2(%arg0: i32) -> (i32, i32) {
    %c0_i32 = arith.constant 0 : i32
    %c0_i32_0 = arith.constant 0 : i32
    %c0_i32_1 = arith.constant 0 : i32
    return %c0_i32, %c0_i32_0 : i32, i32
  }
  func.func @transform_3(%arg0: i32) -> (i32, i32) {
    %c0_i32 = arith.constant 0 : i32
    %c0_i32_0 = arith.constant 0 : i32
    %c0_i32_1 = arith.constant 0 : i32
    return %c0_i32, %c0_i32_0 : i32, i32
  }
  func.func @transform_4(%arg0: i32) -> (i32, i32) {
    %c0_i32 = arith.constant 0 : i32
    %c0_i32_0 = arith.constant 0 : i32
    %c0_i32_1 = arith.constant 0 : i32
    return %c0_i32, %c0_i32_0 : i32, i32
  }
  func.func @transform_5(%arg0: i32) -> (i32, i32) {
    %c0_i32 = arith.constant 0 : i32
    %c0_i32_0 = arith.constant 0 : i32
    %c0_i32_1 = arith.constant 0 : i32
    return %c0_i32, %c0_i32_0 : i32, i32
  }
  func.func @transform_6(%arg0: i32) -> (i32, i32) {
    %c0_i32 = arith.constant 0 : i32
    %c0_i32_0 = arith.constant 0 : i32
    %c0_i32_1 = arith.constant 0 : i32
    return %c0_i32, %c0_i32_0 : i32, i32
  }
  func.func @transform_7(%arg0: i32) -> (i32, i32) {
    %c0_i32 = arith.constant 0 : i32
    %c0_i32_0 = arith.constant 0 : i32
    return %arg0, %c0_i32 : i32, i32
  }
}

</mosaic_0001>

<bundles_post_ra>
// kernel: fc_triplane_forward.1
= control target key start
LH: loop header
LB: loop body
LE: loop exit
PB: predicated region body
PF: predicated region fallthrough
CT: control target
= control target key end

     0   :  { %s1242_s0 = inlined_call_operand.vmem [shape: f32[256,64], index: 0, kind: input, shape index: {}]   ;;  %s1243_s1 = inlined_call_operand.vmem [shape: bf16[64,128], index: 1, kind: input, shape index: {}]   ;;  %s1244_s2 = inlined_call_operand.vmem [shape: f32[1,128], index: 2, kind: input, shape index: {}]   ;;  %s1245_s3 = inlined_call_operand.vmem [shape: bf16[128,128], index: 3, kind: input, shape index: {}]   ;;  %s1246_s4 = inlined_call_operand.vmem [shape: f32[1,128], index: 4, kind: input, shape index: {}]   ;;  %s1247_s5 = inlined_call_operand.vmem [shape: bf16[128,128], index: 5, kind: input, shape index: {}]   ;;  %s1248_s6 = inlined_call_operand.vmem [shape: f32[1,128], index: 6, kind: input, shape index: {}]   ;;  %s1249_s7 = inlined_call_operand.hbm [shape: f32[16,128], index: 7, kind: output, shape index: {}]  }
   0x1   :  { %v871_v0 = vld [vmem:[%s1243_s1 + $0x18] sm:$0xff]  ;;  %v870_v1 = vld [vmem:[%s1243_s1 + $0x10] sm:$0xff] }
   0x2   :  { %165 = vmatpush.bf16.msra.mxu0 %v871_v0  ;;  %888 = vmatpush.bf16.msra.mxu2 %v871_v0 }
   0x3   :  { %12 = vsyncpa [#allocation3], 0  ;;  %v869_v2 = vld [vmem:[%s1243_s1 + $0x8] sm:$0xff]  ;;  %v868_v3 = vld [vmem:[%s1243_s1] sm:$0xff]  ;;  %vm112_vm0 = vcmask 523264   ;;  %vm667_vm1 = vcmask 1041409  }
   0x4   :  { %v28_v4 = vld [vmem:[%s1242_s0] sm:$0xff]  ;;  %v29_v5 = vld [vmem:[%s1242_s0 + $0x8] sm:$0xff]  ;;  %v30_v7 = vld [vmem:[%s1242_s0 + $0x10] sm:$0xff]  ;;  %vm669_vm2 = vcmask 1042434   ;;  %vm671_vm3 = vcmask 1043459   ;;  %vm673_vm4 = vcmask 1044484  }
   0x5   :  { %v60_v6 = vpack.c.bf16 %v29_v5, %v28_v4  ;;  %v31_v8 = vld [vmem:[%s1242_s0 + $0x18] sm:$0xff]  ;;  %v32_v10 = vld [vmem:[%s1242_s0 + $0x20] sm:$0xff]  ;;  %v33_v11 = vld [vmem:[%s1242_s0 + $0x28] sm:$0xff]  ;;  %vm675_vm5 = vcmask 1045509   ;;  %vm677_vm6 = vcmask 1046534   ;;  %vm679_vm7 = vcmask 1047559  }
   0x6   :  { %166 = vmatpush.bf16.msra.mxu0 %v870_v1  ;;  %889 = vmatpush.bf16.msra.mxu2 %v870_v1  ;;  %v61_v9 = vpack.c.bf16 %v31_v8, %v30_v7  ;;  %v62_v12 = vpack.c.bf16 %v33_v11, %v32_v10  ;;  %v34_v13 = vld [vmem:[%s1242_s0 + $0x30] sm:$0xff]  ;;  %v35_v14 = vld [vmem:[%s1242_s0 + $0x38] sm:$0xff]  ;;  %v36_v16 = vld [vmem:[%s1242_s0 + $0x40] sm:$0xff]  ;;  %s932_s8 = smov [#allocation2]   ;;  %s760_s12 = sshll.u32 %s1249_s7, 4  ;;  %s761_s12 = int_to_ptr.hbm [resolvable:$true] %s760_s12 }
   0x7   :  { %v63_v15 = vpack.c.bf16 %v35_v14, %v34_v13  ;;  %v37_v17 = vld [vmem:[%s1242_s0 + $0x48] sm:$0xff]  ;;  %v879_v19 = vld [vmem:[%s1245_s3 + $0x38] sm:$0xff]  ;;  %v38_v20 = vld [vmem:[%s1242_s0 + $0x50] sm:$0xff]  ;;  %s758_s9 = sshll.u32 %s932_s8, 4  ;;  %s933_s13 = smov 128   ;;  %s759_s9 = int_to_ptr.vmem [resolvable:$true] %s758_s9 }
   0x8   :  { %v64_v18 = vpack.c.bf16 %v37_v17, %v36_v16  ;;  %366 = vmatpush.bf16.msra.mxu1 %v879_v19  ;;  %892 = vmatpush.bf16.msra.mxu3 %v879_v19  ;;  %v39_v21 = vld [vmem:[%s1242_s0 + $0x58] sm:$0xff]  ;;  %v878_v23 = vld [vmem:[%s1245_s3 + $0x30] sm:$0xff]  ;;  %v877_v24 = vld [vmem:[%s1245_s3 + $0x28] sm:$0xff]  ;;  %s934_s14 = smov 8  }
   0x9   :  { %v65_v22 = vpack.c.bf16 %v39_v21, %v38_v20  ;;  %v876_v25 = vld [vmem:[%s1245_s3 + $0x20] sm:$0xff]  ;;  %v41_v27 = vld [vmem:[%s1242_s0 + $0x68] sm:$0xff]  ;;  %v875_v28 = vld [vmem:[%s1245_s3 + $0x18] sm:$0xff] }
   0xa   :  { %167 = vmatpush.bf16.msra.mxu0 %v869_v2  ;;  %890 = vmatpush.bf16.msra.mxu2 %v869_v2  ;;  %v40_v26 = vld [vmem:[%s1242_s0 + $0x60] sm:$0xff]  ;;  %v874_v30 = vld [vmem:[%s1245_s3 + $0x10] sm:$0xff]  ;;  %v47_v32 = vld [vmem:[%s1242_s0 + $0x98] sm:$0xff] }
   0xb   :  { %v66_v29 = vpack.c.bf16 %v41_v27, %v40_v26  ;;  %v46_v31 = vld [vmem:[%s1242_s0 + $0x90] sm:$0xff]  ;;  %v873_v34 = vld [vmem:[%s1245_s3 + $0x8] sm:$0xff]  ;;  %v872_v35 = vld [vmem:[%s1245_s3] sm:$0xff] }
   0xc   :  { %367 = vmatpush.bf16.msra.mxu1 %v878_v23  ;;  %893 = vmatpush.bf16.msra.mxu3 %v878_v23  ;;  %v69_v33 = vpack.c.bf16 %v47_v32, %v46_v31  ;;  %v42_v36 = vld [vmem:[%s1242_s0 + $0x70] sm:$0xff]  ;;  %v43_v37 = vld [vmem:[%s1242_s0 + $0x78] sm:$0xff]  ;;  %v48_v39 = vld [vmem:[%s1242_s0 + $0xa0] sm:$0xff] }
   0xd   :  { %v67_v38 = vpack.c.bf16 %v43_v37, %v42_v36  ;;  %v49_v40 = vld [vmem:[%s1242_s0 + $0xa8] sm:$0xff]  ;;  %v44_v42 = vld [vmem:[%s1242_s0 + $0x80] sm:$0xff]  ;;  %v50_v46 = vld [vmem:[%s1242_s0 + $0xb0] sm:$0xff] }
   0xe   :  { %168 = vmatpush.bf16.msra.mxu0 %v868_v3  ;;  %891 = vmatpush.bf16.msra.mxu2 %v868_v3  ;;  %v70_v41 = vpack.c.bf16 %v49_v40, %v48_v39  ;;  %v45_v43 = vld [vmem:[%s1242_s0 + $0x88] sm:$0xff]  ;;  %v51_v47 = vld [vmem:[%s1242_s0 + $0xb8] sm:$0xff]  ;;  %v1096_v48 = vld [vmem:[%s1244_s2] ss:$0 sm:$0xff] }
   0xf   :  { %v68_v44 = vpack.c.bf16 %v45_v43, %v44_v42  ;;  %v71_v49 = vpack.c.bf16 %v51_v47, %v50_v46  ;;  %v52_v57 = vld [vmem:[%s1242_s0 + $0xc0] sm:$0xff]  ;;  %v53_v58 = vld [vmem:[%s1242_s0 + $0xc8] sm:$0xff]  ;;  %v54_v3 = vld [vmem:[%s1242_s0 + $0xd0] sm:$0xff] }
  0x10   :  { %368 = vmatpush.bf16.msra.mxu1 %v877_v24  ;;  %894 = vmatpush.bf16.msra.mxu3 %v877_v24  ;;  %v72_v59 = vpack.c.bf16 %v53_v58, %v52_v57  ;;  %v55_v4 = vld [vmem:[%s1242_s0 + $0xd8] sm:$0xff]  ;;  %v56_v13 = vld [vmem:[%s1242_s0 + $0xe0] sm:$0xff]  ;;  %v57_v14 = vld [vmem:[%s1242_s0 + $0xe8] sm:$0xff] }
  0x11   :  { %788 = vmatmul.msk.bf16.vlgmr.msra.gmra.mxu0 %vm112_vm0, %v60_v6  ;;  %797 = vmatmul.msk.bf16.vlgmr.msra.gmra.mxu2 %vm112_vm0, %v69_v33  ;;  %v73_v5 = vpack.c.bf16 %v55_v4, %v54_v3  ;;  %v58_v23 = vld [vmem:[%s1242_s0 + $0xf0] sm:$0xff]  ;;  %v59_v24 = vld [vmem:[%s1242_s0 + $0xf8] sm:$0xff] }
  0x14   :  { %369 = vmatpush.bf16.msra.mxu1 %v876_v25  ;;  %895 = vmatpush.bf16.msra.mxu3 %v876_v25  ;;  %v75_v25 = vpack.c.bf16 %v59_v24, %v58_v23 }
  0x18   :  { %370 = vmatpush.bf16.msra.mxu1 %v875_v28  ;;  %896 = vmatpush.bf16.msra.mxu3 %v875_v28 }
  0x1c   :  { %371 = vmatpush.bf16.msra.mxu1 %v874_v30  ;;  %897 = vmatpush.bf16.msra.mxu3 %v874_v30 }
  0x20   :  { %372 = vmatpush.bf16.msra.mxu1 %v873_v34  ;;  %898 = vmatpush.bf16.msra.mxu3 %v873_v34 }
  0x21   :  { %789 = vmatmul.msk.bf16.gmra.mxu0 %vm112_vm0, %v61_v9  ;;  %798 = vmatmul.msk.bf16.gmra.mxu2 %vm112_vm0, %v70_v41 }
  0x24   :  { %373 = vmatpush.bf16.msra.mxu1 %v872_v35  ;;  %899 = vmatpush.bf16.msra.mxu3 %v872_v35 }
  0x31   :  { %790 = vmatmul.msk.bf16.gmra.mxu0 %vm112_vm0, %v62_v12  ;;  %799 = vmatmul.msk.bf16.gmra.mxu2 %vm112_vm0, %v71_v49 }
  0x41   :  { %791 = vmatmul.msk.bf16.gmra.mxu0 %vm112_vm0, %v63_v15  ;;  %800 = vmatmul.msk.bf16.gmra.mxu2 %vm112_vm0, %v72_v59  ;;  %v74_v15 = vpack.c.bf16 %v57_v14, %v56_v13 }
  0x51   :  { %792 = vmatmul.msk.bf16.gmra.mxu0 %vm112_vm0, %v64_v18  ;;  %801 = vmatmul.msk.bf16.gmra.mxu2 %vm112_vm0, %v73_v5 }
  0x61   :  { %793 = vmatmul.msk.bf16.gmra.mxu0 %vm112_vm0, %v65_v22  ;;  %802 = vmatmul.msk.bf16.gmra.mxu2 %vm112_vm0, %v74_v15 }
  0x71   :  { %794 = vmatmul.msk.bf16.gmra.mxu0 %vm112_vm0, %v66_v29  ;;  %803 = vmatmul.msk.bf16.gmra.mxu2 %vm112_vm0, %v75_v25 }
  0x81   :  { %795 = vmatmul.msk.bf16.gmra.mxu0 %vm112_vm0, %v67_v38 }
  0x8e   :  { %v170_v45 = vpop.f32.mrf.mxu0 }
  0x8f   :  { %v171_v50 = vadd.f32 %v1096_v48, %v170_v45 }
  0x91   :  { %796 = vmatmul.msk.bf16.gmra.mxu0 %vm112_vm0, %v68_v44  ;;  %v250_v53 = vmax.f32 %v171_v50, 0.0 }
  0x94   :  { %v215_v47 = vpop.f32.mrf.mxu2 }
  0x95   :  { %v216_v5 = vadd.f32 %v1096_v48, %v215_v47 }
  0x96   :  { %v172_v51 = vpop.f32.mrf.mxu0 }
  0x97   :  { %v173_v52 = vadd.f32 %v1096_v48, %v172_v51 }
  0x99   :  { %v251_v54 = vmax.f32 %v173_v52, 0.0 }
  0x9b   :  { %v282_v55 = vpack.c.bf16 %v251_v54, %v250_v53 }
  0x9c   :  { %v217_v52 = vpop.f32.mrf.mxu2 }
  0x9d   :  { %374 = vmatmul.bf16.vlgmr.msra.gmra.mxu1 %v282_v55 }
  0x9e   :  { %v175_v56 = vpop.f32.mrf.mxu0 }
  0x9f   :  { %v176_v60 = vadd.f32 %v1096_v48, %v175_v56 }
  0xa1   :  { %v252_v63 = vmax.f32 %v176_v60, 0.0 }
  0xa4   :  { %v220_v57 = vpop.f32.mrf.mxu2 }
  0xa6   :  { %v177_v61 = vpop.f32.mrf.mxu0 }
  0xa7   :  { %v178_v62 = vadd.f32 %v1096_v48, %v177_v61 }
  0xa9   :  { %v253_v0 = vmax.f32 %v178_v62, 0.0 }
  0xab   :  { %v283_v1 = vpack.c.bf16 %v253_v0, %v252_v63 }
  0xad   :  { %379 = vmatmul.bf16.gmra.mxu1 %v283_v1  ;;  %v222_v1 = vpop.f32.mrf.mxu2 }
  0xae   :  { %v180_v2 = vpop.f32.mrf.mxu0  ;;  %v223_v23 = vadd.f32 %v1096_v48, %v222_v1 }
  0xaf   :  { %v181_v6 = vadd.f32 %v1096_v48, %v180_v2  ;;  %v1149_v2 = vld [vmem:[%s1246_s4] ss:$0 sm:$0xff] }
  0xb1   :  { %v254_v9 = vmax.f32 %v181_v6, 0.0  ;;  %v218_v6 = vadd.f32 %v1096_v48, %v217_v52 }
  0xb6   :  { %v182_v7 = vpop.f32.mrf.mxu0 }
  0xb7   :  { %v183_v8 = vadd.f32 %v1096_v48, %v182_v7 }
  0xb9   :  { %v255_v10 = vmax.f32 %v183_v8, 0.0 }
  0xbb   :  { %v284_v11 = vpack.c.bf16 %v255_v10, %v254_v9  ;;  %v225_v10 = vpop.f32.mrf.mxu2 }
  0xbd   :  { %384 = vmatmul.bf16.gmra.mxu1 %v284_v11  ;;  %v268_v11 = vmax.f32 %v216_v5, 0.0 }
  0xbe   :  { %v185_v12 = vpop.f32.mrf.mxu0 }
  0xbf   :  { %v186_v16 = vadd.f32 %v1096_v48, %v185_v12  ;;  %v269_v12 = vmax.f32 %v218_v6, 0.0 }
  0xc1   :  { %v256_v19 = vmax.f32 %v186_v16, 0.0  ;;  %v291_v16 = vpack.c.bf16 %v269_v12, %v268_v11 }
  0xc6   :  { %v187_v17 = vpop.f32.mrf.mxu0 }
  0xc7   :  { %v188_v18 = vadd.f32 %v1096_v48, %v187_v17 }
  0xc9   :  { %v257_v20 = vmax.f32 %v188_v18, 0.0  ;;  %v227_v18 = vpop.f32.mrf.mxu2 }
  0xcb   :  { %v285_v21 = vpack.c.bf16 %v257_v20, %v256_v19 }
  0xcd   :  { %389 = vmatmul.bf16.gmra.mxu1 %v285_v21 }
  0xce   :  { %v190_v22 = vpop.f32.mrf.mxu0 }
  0xcf   :  { %v191_v26 = vadd.f32 %v1096_v48, %v190_v22  ;;  %v221_v22 = vadd.f32 %v1096_v48, %v220_v57 }
  0xd1   :  { %v258_v29 = vmax.f32 %v191_v26, 0.0 }
  0xd6   :  { %v192_v27 = vpop.f32.mrf.mxu0 }
  0xd7   :  { %v193_v28 = vadd.f32 %v1096_v48, %v192_v27 }
  0xd9   :  { %v259_v30 = vmax.f32 %v193_v28, 0.0  ;;  %v270_v28 = vmax.f32 %v221_v22, 0.0 }
  0xdb   :  { %v286_v31 = vpack.c.bf16 %v259_v30, %v258_v29  ;;  %v271_v29 = vmax.f32 %v223_v23, 0.0 }
  0xdd   :  { %394 = vmatmul.bf16.gmra.mxu1 %v286_v31 }
  0xde   :  { %v195_v32 = vpop.f32.mrf.mxu0 }
  0xdf   :  { %v196_v33 = vadd.f32 %v1096_v48, %v195_v32 }
  0xe1   :  { %v260_v36 = vmax.f32 %v196_v33, 0.0  ;;  %v230_v33 = vpop.f32.mrf.mxu2 }
  0xe6   :  { %v197_v34 = vpop.f32.mrf.mxu0 }
  0xe7   :  { %v198_v35 = vadd.f32 %v1096_v48, %v197_v34 }
  0xe9   :  { %v261_v37 = vmax.f32 %v198_v35, 0.0 }
  0xeb   :  { %v287_v38 = vpack.c.bf16 %v261_v37, %v260_v36  ;;  %v292_v36 = vpack.c.bf16 %v271_v29, %v270_v28 }
  0xed   :  { %399 = vmatmul.bf16.gmra.mxu1 %v287_v38 }
  0xee   :  { %v200_v39 = vpop.f32.mrf.mxu0 }
  0xef   :  { %v201_v40 = vadd.f32 %v1096_v48, %v200_v39 }
  0xf1   :  { %v262_v43 = vmax.f32 %v201_v40, 0.0 }
  0xf6   :  { %v202_v41 = vpop.f32.mrf.mxu0 }
  0xf7   :  { %v203_v42 = vadd.f32 %v1096_v48, %v202_v41 }
  0xf9   :  { %v263_v44 = vmax.f32 %v203_v42, 0.0  ;;  %v226_v42 = vadd.f32 %v1096_v48, %v225_v10 }
  0xfb   :  { %v288_v45 = vpack.c.bf16 %v263_v44, %v262_v43 }
  0xfd   :  { %404 = vmatmul.bf16.gmra.mxu1 %v288_v45 }
  0xfe   :  { %v205_v46 = vpop.f32.mrf.mxu0 }
  0xff   :  { %v206_v49 = vadd.f32 %v1096_v48, %v205_v46  ;;  %v228_v46 = vadd.f32 %v1096_v48, %v227_v18 }
 0x101   :  { %v264_v53 = vmax.f32 %v206_v49, 0.0  ;;  %v232_v49 = vpop.f32.mrf.mxu2 }
 0x106   :  { %v207_v50 = vpop.f32.mrf.mxu0 }
 0x107   :  { %v208_v51 = vadd.f32 %v1096_v48, %v207_v50 }
 0x109   :  { %v265_v54 = vmax.f32 %v208_v51, 0.0 }
 0x10b   :  { %v289_v55 = vpack.c.bf16 %v265_v54, %v264_v53  ;;  %v272_v53 = vmax.f32 %v226_v42, 0.0 }
 0x10d   :  { %409 = vmatmul.bf16.gmra.mxu1 %v289_v55 }
 0x10e   :  { %v210_v56 = vpop.f32.mrf.mxu0 }
 0x10f   :  { %v211_v58 = vadd.f32 %v1096_v48, %v210_v56  ;;  %v273_v56 = vmax.f32 %v228_v46, 0.0 }
 0x111   :  { %v266_v61 = vmax.f32 %v211_v58, 0.0 }
 0x116   :  { %v212_v59 = vpop.f32.mrf.mxu0 }
 0x117   :  { %v213_v60 = vadd.f32 %v1096_v48, %v212_v59 }
 0x119   :  { %v267_v62 = vmax.f32 %v213_v60, 0.0 }
 0x11a   :  { %v375_v63 = vpop.f32.mrf.mxu1 }
 0x11b   :  { %v290_v0 = vpack.c.bf16 %v267_v62, %v266_v61  ;;  %v376_v3 = vadd.f32 %v1149_v2, %v375_v63  ;;  %v293_v62 = vpack.c.bf16 %v273_v56, %v272_v53  ;;  %v887_v56 = vld [vmem:[%s1247_s5 + $0x38] sm:$0xff] }
 0x11c   :  { %738 = vmatpush.bf16.msrb.mxu2 %v887_v56 }
 0x11d   :  { %414 = vmatmul.bf16.vlgmr.msra.gmra.mxu3 %v290_v0  ;;  %v455_v8 = vmax.f32 %v376_v3, 0.0  ;;  %v235_v0 = vpop.f32.mrf.mxu2 }
 0x122   :  { %v377_v4 = vpop.f32.mrf.mxu1 }
 0x123   :  { %v378_v7 = vadd.f32 %v1149_v2, %v377_v4 }
 0x125   :  { %v456_v9 = vmax.f32 %v378_v7, 0.0  ;;  %v231_v7 = vadd.f32 %v1096_v48, %v230_v33 }
 0x127   :  { %v487_v13 = vmax.f32 %v455_v8, %v456_v9  ;;  %v233_v8 = vadd.f32 %v1096_v48, %v232_v49 }
 0x129   :  { %v488_v15 = vrot.slane %v487_v13, 4 }
 0x12a   :  { %v380_v14 = vpop.f32.mrf.mxu1 }
 0x12b   :  { %v489_v17 = vmax.f32 %v487_v13, %v488_v15  ;;  %v381_v19 = vadd.f32 %v1149_v2, %v380_v14  ;;  %v274_v14 = vmax.f32 %v231_v7, 0.0  ;;  %v275_v15 = vmax.f32 %v233_v8, 0.0 }
 0x12d   :  { %419 = vmatmul.bf16.gmra.mxu3 %v291_v16  ;;  %v490_v21 = vrot.slane %v489_v17, 2  ;;  %v457_v25 = vmax.f32 %v381_v19, 0.0 }
 0x12f   :  { %v491_v27 = vmax.f32 %v489_v17, %v490_v21  ;;  %v237_v17 = vpop.f32.mrf.mxu2  ;;  %v294_v21 = vpack.c.bf16 %v275_v15, %v274_v14 }
 0x130   :  { %v238_v28 = vadd.f32 %v1096_v48, %v237_v17 }
 0x131   :  { %v492_v34 = vrot.slane %v491_v27, 1 }
 0x132   :  { %v382_v20 = vpop.f32.mrf.mxu1 }
 0x133   :  { %v383_v24 = vadd.f32 %v1149_v2, %v382_v20  ;;  %v493_v38 = vmax.f32 %v491_v27, %v492_v34  ;;  %v236_v27 = vadd.f32 %v1096_v48, %v235_v0 }
 0x135   :  { %v458_v26 = vmax.f32 %v383_v24, 0.0  ;;  %v599_v44 = vpack.c.bf16 %v493_v38, %v493_v38 }
 0x137   :  { %v494_v30 = vmax.f32 %v457_v25, %v458_v26  ;;  %v651_v54 = vunpack.c.l.b16 %v599_v44  ;;  %v240_v25 = vpop.f32.mrf.mxu2 }
 0x139   :  { %v495_v31 = vrot.slane %v494_v30, 4 }
 0x13a   :  { %v385_v32 = vpop.f32.mrf.mxu1 }
 0x13b   :  { %v496_v35 = vmax.f32 %v494_v30, %v495_v31  ;;  %v386_v41 = vadd.f32 %v1149_v2, %v385_v32  ;;  %v276_v31 = vmax.f32 %v236_v27, 0.0  ;;  %v277_v32 = vmax.f32 %v238_v28, 0.0 }
 0x13d   :  { %v497_v37 = vrot.slane %v496_v35, 2  ;;  %424 = vmatmul.bf16.gmra.mxu3 %v292_v36  ;;  %v459_v51 = vmax.f32 %v386_v41, 0.0  ;;  %v295_v34 = vpack.c.bf16 %v277_v32, %v276_v31  ;;  %v241_v36 = vadd.f32 %v1096_v48, %v240_v25 }
 0x13f   :  { %v498_v39 = vmax.f32 %v496_v35, %v497_v37  ;;  %v242_v35 = vpop.f32.mrf.mxu2 }
 0x140   :  { %v243_v37 = vadd.f32 %v1096_v48, %v242_v35 }
 0x141   :  { %v499_v40 = vrot.slane %v498_v39, 1 }
 0x142   :  { %v387_v43 = vpop.f32.mrf.mxu1 }
 0x143   :  { %v500_v45 = vmax.f32 %v498_v39, %v499_v40  ;;  %v388_v47 = vadd.f32 %v1149_v2, %v387_v43  ;;  %v278_v39 = vmax.f32 %v241_v36, 0.0  ;;  %v279_v40 = vmax.f32 %v243_v37, 0.0 }
 0x145   :  { %v600_v50 = vpack.c.bf16 %v500_v45, %v500_v45  ;;  %v460_v52 = vmax.f32 %v388_v47, 0.0  ;;  %v296_v41 = vpack.c.bf16 %v279_v40, %v278_v39 }
 0x147   :  { %v652_v55 = vunpack.c.l.b16 %v600_v50  ;;  %v501_v57 = vmax.f32 %v459_v51, %v460_v52  ;;  %v245_v38 = vpop.f32.mrf.mxu2 }
 0x148   :  { %v246_v43 = vadd.f32 %v1096_v48, %v245_v38 }
 0x149   :  { %v668_v58 = vsel %vm667_vm1, %v652_v55, %v651_v54  ;;  %v502_v59 = vrot.slane %v501_v57, 4 }
 0x14a   :  { %v390_v60 = vpop.f32.mrf.mxu1  ;;  %v280_v45 = vmax.f32 %v246_v43, 0.0 }
 0x14b   :  { %v503_v61 = vmax.f32 %v501_v57, %v502_v59  ;;  %v391_v4 = vadd.f32 %v1149_v2, %v390_v60 }
 0x14d   :  { %v504_v63 = vrot.slane %v503_v61, 2  ;;  %429 = vmatmul.bf16.gmra.mxu3 %v293_v62  ;;  %v461_v11 = vmax.f32 %v391_v4, 0.0 }
 0x14f   :  { %v505_v1 = vmax.f32 %v503_v61, %v504_v63  ;;  %v247_v42 = vpop.f32.mrf.mxu2 }
 0x150   :  { %v248_v44 = vadd.f32 %v1096_v48, %v247_v42 }
 0x151   :  { %v506_v3 = vrot.slane %v505_v1, 1 }
 0x152   :  { %v392_v5 = vpop.f32.mrf.mxu1  ;;  %v281_v46 = vmax.f32 %v248_v44, 0.0 }
 0x153   :  { %v507_v6 = vmax.f32 %v505_v1, %v506_v3  ;;  %v393_v9 = vadd.f32 %v1149_v2, %v392_v5 }
 0x154   :  { %v297_v47 = vpack.c.bf16 %v281_v46, %v280_v45  ;;  %v884_v46 = vld [vmem:[%s1247_s5 + $0x20] sm:$0xff] }
 0x155   :  { %v601_v10 = vpack.c.bf16 %v507_v6, %v507_v6  ;;  %v462_v12 = vmax.f32 %v393_v9, 0.0  ;;  %v886_v6 = vld [vmem:[%s1247_s5 + $0x30] sm:$0xff] }
 0x156   :  { %739 = vmatpush.bf16.msrb.mxu2 %v886_v6 }
 0x157   :  { %v653_v13 = vunpack.c.l.b16 %v601_v10  ;;  %v508_v16 = vmax.f32 %v461_v11, %v462_v12 }
 0x159   :  { %v670_v18 = vsel %vm669_vm2, %v653_v13, %v668_v58  ;;  %v509_v19 = vrot.slane %v508_v16, 4 }
 0x15a   :  { %v1185_v63 = vpop.f32.mrf.mxu1 }
 0x15b   :  { %v510_v20 = vmax.f32 %v508_v16, %v509_v19 }
 0x15d   :  { %v511_v22 = vrot.slane %v510_v20, 2  ;;  %434 = vmatmul.bf16.gmra.mxu3 %v294_v21 }
 0x15f   :  { %v512_v23 = vmax.f32 %v510_v20, %v511_v22 }
 0x161   :  { %v513_v24 = vrot.slane %v512_v23, 1 }
 0x162   :  { %v397_v11 = vpop.f32.mrf.mxu1 }
 0x163   :  { %v514_v26 = vmax.f32 %v512_v23, %v513_v24 }
 0x165   :  { %v602_v29 = vpack.c.bf16 %v514_v26, %v514_v26  ;;  %v885_v26 = vld [vmem:[%s1247_s5 + $0x28] sm:$0xff] }
 0x166   :  { %740 = vmatpush.bf16.msrb.mxu2 %v885_v26 }
 0x167   :  { %v654_v30 = vunpack.c.l.b16 %v602_v29 }
 0x169   :  { %v1172_v33 = vsel %vm671_vm3, %v654_v30, %v670_v18 }
 0x16a   :  { %v400_v27 = vpop.f32.mrf.mxu1  ;;  %741 = vmatpush.bf16.msrb.mxu2 %v884_v46 }
 0x16d   :  { %439 = vmatmul.bf16.gmra.mxu3 %v295_v34 }
 0x172   :  { %v402_v37 = vpop.f32.mrf.mxu1 }
 0x17d   :  { %444 = vmatmul.bf16.gmra.mxu3 %v296_v41 }
 0x18d   :  { %449 = vmatmul.bf16.gmra.mxu3 %v297_v47 }
 0x1a0   :  { %v415_v49 = vpop.f32.mrf.mxu3 }
 0x1a1   :  { %v416_v50 = vadd.f32 %v1149_v2, %v415_v49 }
 0x1a3   :  { %v471_v53 = vmax.f32 %v416_v50, 0.0 }
 0x1a8   :  { %v417_v51 = vpop.f32.mrf.mxu3 }
 0x1a9   :  { %v418_v52 = vadd.f32 %v1149_v2, %v417_v51 }
 0x1ab   :  { %v472_v54 = vmax.f32 %v418_v52, 0.0  ;;  %v405_v52 = vpop.f32.mrf.mxu1 }
 0x1ad   :  { %v543_v55 = vmax.f32 %v471_v53, %v472_v54 }
 0x1af   :  { %v544_v58 = vrot.slane %v543_v55, 4 }
 0x1b0   :  { %v420_v57 = vpop.f32.mrf.mxu3 }
 0x1b1   :  { %v545_v48 = vmax.f32 %v543_v55, %v544_v58  ;;  %v421_v59 = vadd.f32 %v1149_v2, %v420_v57 }
 0x1b3   :  { %v546_v61 = vrot.slane %v545_v48, 2  ;;  %v473_v0 = vmax.f32 %v421_v59, 0.0 }
 0x1b5   :  { %v547_v3 = vmax.f32 %v545_v48, %v546_v61  ;;  %v407_v48 = vpop.f32.mrf.mxu1 }
 0x1b7   :  { %v548_v8 = vrot.slane %v547_v3, 1 }
 0x1b8   :  { %v422_v60 = vpop.f32.mrf.mxu3 }
 0x1b9   :  { %v423_v62 = vadd.f32 %v1149_v2, %v422_v60  ;;  %v549_v12 = vmax.f32 %v547_v3, %v548_v8  ;;  %v883_v60 = vld [vmem:[%s1247_s5 + $0x18] sm:$0xff]  ;;  %v882_v3 = vld [vmem:[%s1247_s5 + $0x10] sm:$0xff] }
 0x1ba   :  { %742 = vmatpush.bf16.msrb.mxu2 %v883_v60 }
 0x1bb   :  { %v474_v1 = vmax.f32 %v423_v62, 0.0  ;;  %v607_v17 = vpack.c.bf16 %v549_v12, %v549_v12  ;;  %v396_v12 = vadd.f32 %v1149_v2, %v1185_v63 }
 0x1bd   :  { %v550_v4 = vmax.f32 %v473_v0, %v474_v1  ;;  %v659_v23 = vunpack.c.l.b16 %v607_v17  ;;  %v410_v0 = vpop.f32.mrf.mxu1  ;;  %v463_v63 = vmax.f32 %v396_v12, 0.0 }
 0x1be   :  { %743 = vmatpush.bf16.msrb.mxu2 %v882_v3 }
 0x1bf   :  { %v551_v5 = vrot.slane %v550_v4, 4 }
 0x1c0   :  { %v425_v7 = vpop.f32.mrf.mxu3 }
 0x1c1   :  { %v552_v9 = vmax.f32 %v550_v4, %v551_v5  ;;  %v426_v15 = vadd.f32 %v1149_v2, %v425_v7  ;;  %v881_v4 = vld [vmem:[%s1247_s5 + $0x8] sm:$0xff]  ;;  %v398_v5 = vadd.f32 %v1149_v2, %v397_v11 }
 0x1c2   :  { %744 = vmatpush.bf16.msrb.mxu2 %v881_v4 }
 0x1c3   :  { %v553_v10 = vrot.slane %v552_v9, 2  ;;  %v475_v21 = vmax.f32 %v426_v15, 0.0  ;;  %v401_v15 = vadd.f32 %v1149_v2, %v400_v27  ;;  %v464_v17 = vmax.f32 %v398_v5, 0.0 }
 0x1c5   :  { %v554_v13 = vmax.f32 %v552_v9, %v553_v10  ;;  %v412_v6 = vpop.f32.mrf.mxu1  ;;  %v403_v9 = vadd.f32 %v1149_v2, %v402_v37 }
 0x1c7   :  { %v555_v14 = vrot.slane %v554_v13, 1 }
 0x1c8   :  { %v427_v16 = vpop.f32.mrf.mxu3 }
 0x1c9   :  { %v556_v18 = vmax.f32 %v554_v13, %v555_v14  ;;  %v428_v19 = vadd.f32 %v1149_v2, %v427_v16  ;;  %v408_v13 = vadd.f32 %v1149_v2, %v407_v48  ;;  %v413_v16 = vadd.f32 %v1149_v2, %v412_v6 }
 0x1cb   :  { %v608_v20 = vpack.c.bf16 %v556_v18, %v556_v18  ;;  %v476_v22 = vmax.f32 %v428_v19, 0.0  ;;  %v406_v18 = vadd.f32 %v1149_v2, %v405_v52  ;;  %v470_v26 = vmax.f32 %v413_v16, 0.0 }
 0x1cd   :  { %v660_v24 = vunpack.c.l.b16 %v608_v20  ;;  %v557_v25 = vmax.f32 %v475_v21, %v476_v22  ;;  %v466_v20 = vmax.f32 %v403_v9, 0.0  ;;  %v411_v21 = vadd.f32 %v1149_v2, %v410_v0 }
 0x1cf   :  { %v681_v28 = vsel %vm667_vm1, %v660_v24, %v659_v23  ;;  %v558_v29 = vrot.slane %v557_v25, 4  ;;  %v468_v23 = vmax.f32 %v408_v13, 0.0 }
 0x1d0   :  { %v430_v30 = vpop.f32.mrf.mxu3 }
 0x1d1   :  { %v559_v31 = vmax.f32 %v557_v25, %v558_v29  ;;  %v431_v36 = vadd.f32 %v1149_v2, %v430_v30  ;;  %v465_v25 = vmax.f32 %v401_v15, 0.0  ;;  %v515_v29 = vmax.f32 %v463_v63, %v464_v17 }
 0x1d2   :  { %v467_v30 = vmax.f32 %v406_v18, 0.0 }
 0x1d3   :  { %v560_v32 = vrot.slane %v559_v31, 2  ;;  %v477_v42 = vmax.f32 %v431_v36, 0.0 }
 0x1d5   :  { %v561_v34 = vmax.f32 %v559_v31, %v560_v32 }
 0x1d7   :  { %v562_v35 = vrot.slane %v561_v34, 1 }
 0x1d8   :  { %v432_v38 = vpop.f32.mrf.mxu3 }
 0x1d9   :  { %v563_v39 = vmax.f32 %v561_v34, %v562_v35  ;;  %v433_v40 = vadd.f32 %v1149_v2, %v432_v38  ;;  %v522_v34 = vmax.f32 %v465_v25, %v466_v20  ;;  %v469_v35 = vmax.f32 %v411_v21, 0.0 }
 0x1da   :  { %v529_v38 = vmax.f32 %v467_v30, %v468_v23 }
 0x1db   :  { %v609_v41 = vpack.c.bf16 %v563_v39, %v563_v39  ;;  %v478_v43 = vmax.f32 %v433_v40, 0.0  ;;  %v536_v39 = vmax.f32 %v469_v35, %v470_v26 }
 0x1dd   :  { %v661_v44 = vunpack.c.l.b16 %v609_v41  ;;  %v564_v45 = vmax.f32 %v477_v42, %v478_v43  ;;  %v880_v42 = vld [vmem:[%s1247_s5] sm:$0xff]  ;;  %v516_v43 = vrot.slane %v515_v29, 4 }
 0x1de   :  { %745 = vmatpush.bf16.msrb.mxu2 %v880_v42 }
 0x1df   :  { %v682_v47 = vsel %vm669_vm2, %v661_v44, %v681_v28  ;;  %v565_v49 = vrot.slane %v564_v45, 4  ;;  %v517_v52 = vmax.f32 %v515_v29, %v516_v43 }
 0x1e0   :  { %v435_v50 = vpop.f32.mrf.mxu3 }
 0x1e1   :  { %v566_v51 = vmax.f32 %v564_v45, %v565_v49  ;;  %v436_v14 = vadd.f32 %v1149_v2, %v435_v50  ;;  %v523_v45 = vrot.slane %v522_v34, 4  ;;  %v530_v49 = vrot.slane %v529_v38, 4 }
 0x1e2   :  { %v537_v50 = vrot.slane %v536_v39, 4 }
 0x1e3   :  { %v567_v53 = vrot.slane %v566_v51, 2  ;;  %v479_v24 = vmax.f32 %v436_v14, 0.0 }
 0x1e4   :  { %v538_v48 = vmax.f32 %v536_v39, %v537_v50 }
 0x1e5   :  { %v568_v54 = vmax.f32 %v566_v51, %v567_v53 }
 0x1e6   :  { %v539_v4 = vrot.slane %v538_v48, 2 }
 0x1e7   :  { %v569_v55 = vrot.slane %v568_v54, 1 }
 0x1e8   :  { %v437_v56 = vpop.f32.mrf.mxu3  ;;  %v540_v15 = vmax.f32 %v538_v48, %v539_v4 }
 0x1e9   :  { %v570_v57 = vmax.f32 %v568_v54, %v569_v55  ;;  %v438_v7 = vadd.f32 %v1149_v2, %v437_v56  ;;  %v524_v55 = vmax.f32 %v522_v34, %v523_v45 }
 0x1ea   :  { %v541_v23 = vrot.slane %v540_v15, 1 }
 0x1eb   :  { %v610_v58 = vpack.c.bf16 %v570_v57, %v570_v57  ;;  %v480_v19 = vmax.f32 %v438_v7, 0.0  ;;  %v531_v57 = vmax.f32 %v529_v38, %v530_v49 }
 0x1ed   :  { %v662_v59 = vunpack.c.l.b16 %v610_v58  ;;  %v571_v31 = vmax.f32 %v479_v24, %v480_v19 }
 0x1ef   :  { %v1206_v61 = vsel %vm671_vm3, %v662_v59, %v682_v47  ;;  %v572_v44 = vrot.slane %v571_v31, 4  ;;  %v518_v59 = vrot.slane %v517_v52, 2 }
 0x1f0   :  { %v440_v62 = vpop.f32.mrf.mxu3 }
 0x1f1   :  { %v441_v11 = vadd.f32 %v1149_v2, %v440_v62  ;;  %v573_v53 = vmax.f32 %v571_v31, %v572_v44  ;;  %v525_v62 = vrot.slane %v524_v55, 2  ;;  %v519_v6 = vmax.f32 %v517_v52, %v518_v59 }
 0x1f2   :  { %v542_v31 = vmax.f32 %v540_v15, %v541_v23 }
 0x1f3   :  { %v481_v28 = vmax.f32 %v441_v11, 0.0  ;;  %v574_v60 = vrot.slane %v573_v53, 2  ;;  %v526_v9 = vmax.f32 %v524_v55, %v525_v62  ;;  %v520_v17 = vrot.slane %v519_v6, 1 }
 0x1f5   :  { %v575_v7 = vmax.f32 %v573_v53, %v574_v60  ;;  %v527_v19 = vrot.slane %v526_v9, 1  ;;  %v521_v25 = vmax.f32 %v519_v6, %v520_v17 }
 0x1f7   :  { %v576_v18 = vrot.slane %v575_v7, 1  ;;  %v603_v34 = vpack.c.bf16 %v521_v25, %v521_v25 }
 0x1f8   :  { %v442_v1 = vpop.f32.mrf.mxu3 }
 0x1f9   :  { %v443_v10 = vadd.f32 %v1149_v2, %v442_v1  ;;  %v532_v1 = vrot.slane %v531_v57, 2  ;;  %v577_v26 = vmax.f32 %v575_v7, %v576_v18  ;;  %v655_v43 = vunpack.c.l.b16 %v603_v34 }
 0x1fb   :  { %v482_v22 = vmax.f32 %v443_v10, 0.0  ;;  %v533_v13 = vmax.f32 %v531_v57, %v532_v1  ;;  %v611_v35 = vpack.c.bf16 %v577_v26, %v577_v26  ;;  %v674_v53 = vsel %vm673_vm4, %v655_v43, %v1172_v33 }
 0x1fd   :  { %v578_v36 = vmax.f32 %v481_v28, %v482_v22  ;;  %v534_v22 = vrot.slane %v533_v13, 1  ;;  %v528_v28 = vmax.f32 %v526_v9, %v527_v19  ;;  %v663_v44 = vunpack.c.l.b16 %v611_v35 }
 0x1ff   :  { %v579_v46 = vrot.slane %v578_v36, 4 }
 0x200   :  { %v445_v8 = vpop.f32.mrf.mxu3 }
 0x201   :  { %v446_v27 = vadd.f32 %v1149_v2, %v445_v8  ;;  %v580_v56 = vmax.f32 %v578_v36, %v579_v46  ;;  %v604_v36 = vpack.c.bf16 %v528_v28, %v528_v28 }
 0x203   :  { %v483_v40 = vmax.f32 %v446_v27, 0.0  ;;  %v581_v0 = vrot.slane %v580_v56, 2  ;;  %v656_v45 = vunpack.c.l.b16 %v604_v36 }
 0x205   :  { %v582_v10 = vmax.f32 %v580_v56, %v581_v0  ;;  %v676_v56 = vsel %vm675_vm5, %v656_v45, %v674_v53  ;;  %v905_v0 = vld [vmem:[%s1248_s6] ss:$0 sm:$0xff] }
 0x207   :  { %v583_v20 = vrot.slane %v582_v10, 1 }
 0x208   :  { %v447_v32 = vpop.f32.mrf.mxu3 }
 0x209   :  { %v448_v37 = vadd.f32 %v1149_v2, %v447_v32  ;;  %v584_v27 = vmax.f32 %v582_v10, %v583_v20 }
 0x20b   :  { %v484_v41 = vmax.f32 %v448_v37, 0.0  ;;  %v612_v37 = vpack.c.bf16 %v584_v27, %v584_v27 }
 0x20d   :  { %v585_v47 = vmax.f32 %v483_v40, %v484_v41  ;;  %v606_v41 = vpack.c.bf16 %v542_v31, %v542_v31  ;;  %v664_v46 = vunpack.c.l.b16 %v612_v37 }
 0x20f   :  { %v586_v51 = vrot.slane %v585_v47, 4  ;;  %v658_v52 = vunpack.c.l.b16 %v606_v41 }
 0x210   :  { %v450_v54 = vpop.f32.mrf.mxu3 }
 0x211   :  { %v587_v58 = vmax.f32 %v585_v47, %v586_v51  ;;  %v451_v5 = vadd.f32 %v1149_v2, %v450_v54  ;;  %v684_v54 = vsel %vm673_vm4, %v663_v44, %v1206_v61 }
 0x212   :  { %v685_v57 = vsel %vm675_vm5, %v664_v46, %v684_v54 }
 0x213   :  { %v588_v3 = vrot.slane %v587_v58, 2  ;;  %v485_v16 = vmax.f32 %v451_v5, 0.0 }
 0x215   :  { %v589_v14 = vmax.f32 %v587_v58, %v588_v3 }
 0x217   :  { %v590_v63 = vrot.slane %v589_v14, 1 }
 0x218   :  { %v452_v8 = vpop.f32.mrf.mxu3 }
 0x219   :  { %v453_v12 = vadd.f32 %v1149_v2, %v452_v8  ;;  %v535_v2 = vmax.f32 %v533_v13, %v534_v22  ;;  %v591_v30 = vmax.f32 %v589_v14, %v590_v63 }
 0x21b   :  { %v486_v11 = vmax.f32 %v453_v12, 0.0  ;;  %v605_v39 = vpack.c.bf16 %v535_v2, %v535_v2  ;;  %v613_v40 = vpack.c.bf16 %v591_v30, %v591_v30 }
 0x21d   :  { %v592_v21 = vmax.f32 %v485_v16, %v486_v11  ;;  %v657_v49 = vunpack.c.l.b16 %v605_v39  ;;  %v665_v50 = vunpack.c.l.b16 %v613_v40 }
 0x21f   :  { %v593_v24 = vrot.slane %v592_v21, 4  ;;  %v678_v58 = vsel %vm677_vm6, %v657_v49, %v676_v56  ;;  %v686_v48 = vsel %vm677_vm6, %v665_v50, %v685_v57 }
 0x220   :  { %v680_v59 = vsel %vm679_vm7, %v658_v52, %v678_v58 }
 0x221   :  { %v594_v29 = vmax.f32 %v592_v21, %v593_v24 }
 0x223   :  { %v595_v32 = vrot.slane %v594_v29, 2 }
 0x225   :  { %v596_v38 = vmax.f32 %v594_v29, %v595_v32 }
 0x227   :  { %v597_v42 = vrot.slane %v596_v38, 1 }
 0x229   :  { %v598_v47 = vmax.f32 %v596_v38, %v597_v42 }
 0x22b   :  { %v614_v51 = vpack.c.bf16 %v598_v47, %v598_v47 }
 0x22d   :  { %v666_v55 = vunpack.c.l.b16 %v614_v51 }
 0x22f   :  { %v687_v60 = vsel %vm679_vm7, %v666_v55, %v686_v48 }
 0x230   :  { %v688_v62 = vpack.c.b16 %v687_v60, %v680_v59 }
 0x232   :  { %746 = vmatmul.bf16.vlgmr.msrb.gmra.mxu2 %v688_v62 }
 0x2b5   :  { %v747_v1 = vpop.f32.mrf.mxu2 }
 0x2b6   :  { %v748_v3 = vadd.f32 %v905_v0, %v747_v1 }
 0x2b8   :  { %752 = vst [vmem:[#allocation2] sm:$0xff] %v748_v3 }
 0x2bd   :  { %v749_v33 = vpop.f32.mrf.mxu2 }
 0x2be   :  { %v750_v61 = vadd.f32 %v905_v0, %v749_v33 }
 0x2c0   :  { %753 = vst [vmem:[#allocation2 + $0x8] sm:$0xff] %v750_v61 }
 0x2c1   :  { %766 = dma.vmem_to_hbm [thread:$0]  %s759_s9, 256, %s761_s12, [#allocation3], %s933_s13, %s933_s13, %s934_s14  }
 0x2c2   :  { %930 = dma.done.wait [#allocation3], 256  }
 0x2c3   :  { %931 = vsyncadd [#allocation3], 4294967040 }
 0x2c4   :  { %771 = vsyncpa [#allocation3], 1 }

</bundles_post_ra>
